<compile_context>
chip_gen: v7x
topology: tpu7x:2x2x1
jax: 0.10.0
libtpu: 0.0.40
codegen_flags: <defaults>
</compile_context>

<pallas_src>
import jax
import jax.numpy as jnp
from jax import lax
from jax.experimental import pallas as pl
from jax.experimental.pallas import tpu as pltpu


def _flash_self_attention_kernel(xq_ref, xkv_ref, wq_ref, wkv_ref,
                                 bq_ref, bkv_ref, o_ref,
                                 q_scr, m_scr, l_scr, acc_scr):
    """One (batch, q-tile, kv-tile) grid step of fused projection + attention.

    xq_ref : (tq, E)  bf16   rows of x for this Q tile
    xkv_ref: (tk, E)  bf16   rows of x for this KV tile
    wq_ref : (E, E)   bf16   Wq^T / sqrt(E)   (scale folded in)
    wkv_ref: (E, 2E)  bf16   [Wk^T | Wv^T]    (fused -> one wide MXU push)
    bq_ref : (1, E)   f32    bq / sqrt(E)
    bkv_ref: (1, 2E)  f32    [bk | bv]
    o_ref  : (tq, E)  x.dtype
    """
    ki = pl.program_id(2)
    e = o_ref.shape[-1]

    @pl.when(ki == 0)
    def _init():
        # Project this Q tile once; it stays resident in VMEM across the KV loop.
        q = jnp.dot(xq_ref[...], wq_ref[...],
                    preferred_element_type=jnp.float32) + bq_ref[...]
        q_scr[...] = q.astype(q_scr.dtype)
        m_scr[...] = jnp.full(m_scr.shape, -jnp.inf, dtype=m_scr.dtype)
        l_scr[...] = jnp.zeros(l_scr.shape, dtype=l_scr.dtype)
        acc_scr[...] = jnp.zeros(acc_scr.shape, dtype=acc_scr.dtype)

    # Fused K/V projection for this KV tile: one bf16 MXU matmul, f32 accum.
    kv = jnp.dot(xkv_ref[...], wkv_ref[...],
                 preferred_element_type=jnp.float32) + bkv_ref[...]   # (tk, 2E)
    k = kv[:, :e].astype(jnp.bfloat16)                                # (tk, E)
    v = kv[:, e:].astype(jnp.bfloat16)                                # (tk, E)

    # scores = Q @ K^T (scale already folded into Wq/bq).  Contract last dims
    # directly on the MXU -> no explicit transpose (no XLU pass).
    s = lax.dot_general(q_scr[...], k, (((1,), (1,)), ((), ())),
                        preferred_element_type=jnp.float32)           # (tq, tk)

    # Online (flash-style) softmax accumulation; math kept in f32.
    m_prev = m_scr[...]
    m_new = jnp.maximum(m_prev, jnp.max(s, axis=-1, keepdims=True))
    alpha = jnp.exp(m_prev - m_new)
    p = jnp.exp(s - m_new)
    l_scr[...] = alpha * l_scr[...] + jnp.sum(p, axis=-1, keepdims=True)
    acc_scr[...] = alpha * acc_scr[...] + jnp.dot(
        p.astype(jnp.bfloat16), v, preferred_element_type=jnp.float32)
    m_scr[...] = m_new

    @pl.when(ki == pl.num_programs(2) - 1)
    def _finalize():
        # Exact divide (not approx reciprocal) so attention weights sum to 1.
        o_ref[...] = (acc_scr[...] / l_scr[...]).astype(o_ref.dtype)


def _pick_tile(dim, target):
    """Largest multiple of 8 that divides `dim` and is <= target (or dim itself)."""
    if dim <= target:
        return dim
    for t in range(target - target % 8, 7, -8):
        if dim % t == 0:
            return t
    return dim


def self_attention(x, wq, bq, wk, bk, wv, bv, *, q_tile=None, kv_tile=None):
    """x: (B, S, E).  W*: (E, E) PyTorch layout (out, in).  b*: (E,)."""
    B, S, E = x.shape
    scale = 1.0 / (float(E) ** 0.5)

    # Pre-transpose / fuse weights once per call.  In a real model these should
    # be cached across steps so the transpose + concat never re-hits HBM.
    wq_t = (wq.T * scale).astype(jnp.bfloat16)                           # (E, E)
    wkv_t = jnp.concatenate([wk.T, wv.T], axis=1).astype(jnp.bfloat16)   # (E, 2E)
    bq2 = (bq * scale).reshape(1, E).astype(jnp.float32)
    bkv2 = jnp.concatenate([bk, bv]).reshape(1, 2 * E).astype(jnp.float32)

    xb = x.astype(jnp.bfloat16)

    tq = q_tile or _pick_tile(S, 256)
    tk = kv_tile or _pick_tile(S, 512)
    assert S % tq == 0 and S % tk == 0
    grid = (B, S // tq, S // tk)

    # VMEM budget hint (double-buffered x/out tiles + resident weights + scratch).
    est = (2 * tq * E * 2 + 2 * tk * E * 2          # x tiles (bf16, 2-deep)
           + 2 * 3 * E * E * 2 + 2 * 3 * E * 4      # weights + biases
           + 2 * tq * E * x.dtype.itemsize          # output tile (2-deep)
           + tq * E * 2 + tq * E * 4 + 2 * tq * 4)  # q / acc / m / l scratch
    vmem_limit = int(min(max(4 * est, 8 * 1024 * 1024), 48 * 1024 * 1024))

    flops = (2 * B * S * E * E                      # Q projection
             + 2 * B * (S // tq) * S * 2 * E * E    # K/V projection (per q-tile)
             + 2 * 2 * B * S * S * E)               # Q@K^T and P@V
    transcendentals = B * S * S + B * S * (S // tk)
    bytes_accessed = (B * S * E * 2 * (1 + S // tq) + 3 * E * E * 2
                      + B * S * E * x.dtype.itemsize)
    ce = pl.CostEstimate(flops=flops, transcendentals=transcendentals,
                         bytes_accessed=bytes_accessed)

    out = pl.pallas_call(
        _flash_self_attention_kernel,
        out_shape=jax.ShapeDtypeStruct((B, S, E), x.dtype),
        grid_spec=pltpu.PrefetchScalarGridSpec(
            num_scalar_prefetch=0,
            grid=grid,
            in_specs=[
                pl.BlockSpec((None, tq, E), lambda b, qi, ki: (b, qi, 0)),  # x (Q rows)
                pl.BlockSpec((None, tk, E), lambda b, qi, ki: (b, ki, 0)),  # x (KV rows)
                pl.BlockSpec((E, E),        lambda b, qi, ki: (0, 0)),      # Wq^T (resident)
                pl.BlockSpec((E, 2 * E),    lambda b, qi, ki: (0, 0)),      # [Wk^T|Wv^T]
                pl.BlockSpec((1, E),        lambda b, qi, ki: (0, 0)),      # bq
                pl.BlockSpec((1, 2 * E),    lambda b, qi, ki: (0, 0)),      # [bk|bv]
            ],
            out_specs=pl.BlockSpec((None, tq, E), lambda b, qi, ki: (b, qi, 0)),
            scratch_shapes=[
                pltpu.VMEM((tq, E), jnp.bfloat16),   # projected Q tile (scaled)
                pltpu.VMEM((tq, 1), jnp.float32),    # running max m
                pltpu.VMEM((tq, 1), jnp.float32),    # running denom l
                pltpu.VMEM((tq, E), jnp.float32),    # output accumulator
            ],
        ),
        compiler_params=pltpu.CompilerParams(
            dimension_semantics=("parallel", "parallel", "arbitrary"),
            vmem_limit_bytes=vmem_limit,
        ),
        cost_estimate=ce,
    )(xb, xb, wq_t, wkv_t, bq2, bkv2)

    return out


def _reference(x, wq, bq, wk, bk, wv, bv):
    q = x @ wq.T + bq
    k = x @ wk.T + bk
    v = x @ wv.T + bv
    scores = jnp.einsum("bse,bte->bst", q, k) / (x.shape[-1] ** 0.5)
    w = jax.nn.softmax(scores, axis=-1)
    return jnp.einsum("bst,bte->bse", w, v)


if __name__ == "__main__":
    B, S, E = 2, 8, 32
    key = jax.random.PRNGKey(0)
    kx, kq, kbq, kk, kbk, kv, kbv = jax.random.split(key, 7)

    x = jax.random.normal(kx, (B, S, E), dtype=jnp.float32)

    # Deterministic parameter init (uniform, like PyTorch's Linear default range).
    bound = 1.0 / (E ** 0.5)
    wq = jax.random.uniform(kq, (E, E), minval=-bound, maxval=bound, dtype=jnp.float32)
    bq = jax.random.uniform(kbq, (E,), minval=-bound, maxval=bound, dtype=jnp.float32)
    wk = jax.random.uniform(kk, (E, E), minval=-bound, maxval=bound, dtype=jnp.float32)
    bk = jax.random.uniform(kbk, (E,), minval=-bound, maxval=bound, dtype=jnp.float32)
    wv = jax.random.uniform(kv, (E, E), minval=-bound, maxval=bound, dtype=jnp.float32)
    bv = jax.random.uniform(kbv, (E,), minval=-bound, maxval=bound, dtype=jnp.float32)

    # Tolerances account for bf16 MXU operands (f32 accumulation).
    out = jax.block_until_ready(self_attention(x, wq, bq, wk, bk, wv, bv))
    ref = _reference(x, wq, bq, wk, bk, wv, bv)
    assert out.shape == (B, S, E)
    assert jnp.allclose(out, ref, atol=3e-2, rtol=3e-2), (
        float(jnp.max(jnp.abs(out - ref))))

    # Exercise the multi-tile flash path (2 q-tiles x 2 kv-tiles per batch).
    S2 = 16
    x2 = jax.random.normal(kx, (B, S2, E), dtype=jnp.float32)
    out2 = jax.block_until_ready(
        self_attention(x2, wq, bq, wk, bk, wv, bv, q_tile=8, kv_tile=8))
    ref2 = _reference(x2, wq, bq, wk, bk, wv, bv)
    assert jnp.allclose(out2, ref2, atol=3e-2, rtol=3e-2), (
        float(jnp.max(jnp.abs(out2 - ref2))))

    print("KERNEL_OK")
</pallas_src>

<mosaic_0001>
module attributes {stable_mosaic.version = 11 : i64} {
  func.func @_flash_self_attention_kernel(%arg0: i32, %arg1: i32, %arg2: i32, %arg3: memref<1x8x32xbf16, #tpu.memory_space<vmem>>, %arg4: memref<1x8x32xbf16, #tpu.memory_space<vmem>>, %arg5: memref<32x32xbf16, #tpu.memory_space<vmem>>, %arg6: memref<32x64xbf16, #tpu.memory_space<vmem>>, %arg7: memref<1x32xf32, #tpu.memory_space<vmem>>, %arg8: memref<1x64xf32, #tpu.memory_space<vmem>>, %arg9: memref<1x8x32xf32, #tpu.memory_space<vmem>>, %arg10: memref<8x32xbf16, #tpu.memory_space<vmem>>, %arg11: memref<8x1xf32, #tpu.memory_space<vmem>>, %arg12: memref<8x1xf32, #tpu.memory_space<vmem>>, %arg13: memref<8x32xf32, #tpu.memory_space<vmem>>) attributes {dimension_semantics = [#tpu.dimension_semantics<parallel>, #tpu.dimension_semantics<parallel>, #tpu.dimension_semantics<arbitrary>], iteration_bounds = array<i64: 2, 1, 1>, scalar_prefetch = 0 : i64, scratch_operands = 4 : i64, tpu.core_type = #tpu.core_type<tc>, window_params = [{transform_indices = @transform_0, window_bounds = array<i64: 1, 8, 32>}, {transform_indices = @transform_1, window_bounds = array<i64: 1, 8, 32>}, {pipeline_mode = #tpu.pipeline_mode<synchronous>, transform_indices = @transform_2, window_bounds = array<i64: 32, 32>}, {pipeline_mode = #tpu.pipeline_mode<synchronous>, transform_indices = @transform_3, window_bounds = array<i64: 32, 64>}, {pipeline_mode = #tpu.pipeline_mode<synchronous>, transform_indices = @transform_4, window_bounds = array<i64: 1, 32>}, {pipeline_mode = #tpu.pipeline_mode<synchronous>, transform_indices = @transform_5, window_bounds = array<i64: 1, 64>}, {transform_indices = @transform_6, window_bounds = array<i64: 1, 8, 32>}]} {
    %c0_i32 = arith.constant 0 : i32
    %0 = arith.cmpi eq, %arg2, %c0_i32 : i32
    %1 = arith.extui %0 : i1 to i32
    %c0_i32_0 = arith.constant 0 : i32
    %2 = arith.cmpi ne, %1, %c0_i32_0 : i32
    scf.if %2 {
      %c0_27 = arith.constant 0 : index
      %c0_28 = arith.constant 0 : index
      %c0_29 = arith.constant 0 : index
      %42 = vector.load %arg3[%c0_27, %c0_28, %c0_29] : memref<1x8x32xbf16, #tpu.memory_space<vmem>>, vector<1x8x32xbf16>
      %43 = vector.shape_cast %42 : vector<1x8x32xbf16> to vector<8x32xbf16>
      %c0_30 = arith.constant 0 : index
      %c0_31 = arith.constant 0 : index
      %44 = vector.load %arg5[%c0_30, %c0_31] : memref<32x32xbf16, #tpu.memory_space<vmem>>, vector<32x32xbf16>
      %cst_32 = arith.constant dense<0.000000e+00> : vector<8x32xf32>
      %45 = tpu.matmul %43, %44, %cst_32 {dimension_numbers = #tpu.dot_dimension_numbers<[1], [0], [0], [1], [0, 0, 1, 1], [], []>} : vector<8x32xbf16>, vector<32x32xbf16>, vector<8x32xf32> -> vector<8x32xf32>
      %c0_33 = arith.constant 0 : index
      %c0_34 = arith.constant 0 : index
      %46 = vector.load %arg7[%c0_33, %c0_34] : memref<1x32xf32, #tpu.memory_space<vmem>>, vector<1x32xf32>
      %47 = vector.broadcast %46 : vector<1x32xf32> to vector<8x32xf32>
      %48 = arith.addf %45, %47 : vector<8x32xf32>
      %49 = arith.truncf %48 : vector<8x32xf32> to vector<8x32xbf16>
      %c0_35 = arith.constant 0 : index
      %c0_36 = arith.constant 0 : index
      %50 = vector.load %arg10[%c0_35, %c0_36] : memref<8x32xbf16, #tpu.memory_space<vmem>>, vector<8x32xbf16>
      tpu.vector_store %arg10[%c0_35, %c0_36], %49 {strides = array<i32>} : memref<8x32xbf16, #tpu.memory_space<vmem>>, vector<8x32xbf16>,
      %cst_37 = arith.constant 0xFF800000 : f32
      %51 = vector.broadcast %cst_37 : f32 to vector<8x1xf32>
      %c0_38 = arith.constant 0 : index
      %c0_39 = arith.constant 0 : index
      %52 = vector.load %arg11[%c0_38, %c0_39] : memref<8x1xf32, #tpu.memory_space<vmem>>, vector<8x1xf32>
      tpu.vector_store %arg11[%c0_38, %c0_39], %51 {strides = array<i32>} : memref<8x1xf32, #tpu.memory_space<vmem>>, vector<8x1xf32>,
      %cst_40 = arith.constant 0.000000e+00 : f32
      %53 = vector.broadcast %cst_40 : f32 to vector<8x1xf32>
      %c0_41 = arith.constant 0 : index
      %c0_42 = arith.constant 0 : index
      %54 = vector.load %arg12[%c0_41, %c0_42] : memref<8x1xf32, #tpu.memory_space<vmem>>, vector<8x1xf32>
      tpu.vector_store %arg12[%c0_41, %c0_42], %53 {strides = array<i32>} : memref<8x1xf32, #tpu.memory_space<vmem>>, vector<8x1xf32>,
      %cst_43 = arith.constant 0.000000e+00 : f32
      %55 = vector.broadcast %cst_43 : f32 to vector<8x32xf32>
      %c0_44 = arith.constant 0 : index
      %c0_45 = arith.constant 0 : index
      %56 = vector.load %arg13[%c0_44, %c0_45] : memref<8x32xf32, #tpu.memory_space<vmem>>, vector<8x32xf32>
      tpu.vector_store %arg13[%c0_44, %c0_45], %55 {strides = array<i32>} : memref<8x32xf32, #tpu.memory_space<vmem>>, vector<8x32xf32>,
    } else {
    }
    %c0 = arith.constant 0 : index
    %c0_1 = arith.constant 0 : index
    %c0_2 = arith.constant 0 : index
    %3 = vector.load %arg4[%c0, %c0_1, %c0_2] : memref<1x8x32xbf16, #tpu.memory_space<vmem>>, vector<1x8x32xbf16>
    %4 = vector.shape_cast %3 : vector<1x8x32xbf16> to vector<8x32xbf16>
    %c0_3 = arith.constant 0 : index
    %c0_4 = arith.constant 0 : index
    %5 = vector.load %arg6[%c0_3, %c0_4] : memref<32x64xbf16, #tpu.memory_space<vmem>>, vector<32x64xbf16>
    %cst = arith.constant dense<0.000000e+00> : vector<8x64xf32>
    %6 = tpu.matmul %4, %5, %cst {dimension_numbers = #tpu.dot_dimension_numbers<[1], [0], [0], [1], [0, 0, 1, 1], [], []>} : vector<8x32xbf16>, vector<32x64xbf16>, vector<8x64xf32> -> vector<8x64xf32>
    %c0_5 = arith.constant 0 : index
    %c0_6 = arith.constant 0 : index
    %7 = vector.load %arg8[%c0_5, %c0_6] : memref<1x64xf32, #tpu.memory_space<vmem>>, vector<1x64xf32>
    %8 = vector.broadcast %7 : vector<1x64xf32> to vector<8x64xf32>
    %9 = arith.addf %6, %8 : vector<8x64xf32>
    %10 = vector.extract_strided_slice %9 {offsets = [0, 0], sizes = [8, 32], strides = [1, 1]} : vector<8x64xf32> to vector<8x32xf32>
    %11 = arith.truncf %10 : vector<8x32xf32> to vector<8x32xbf16>
    %12 = vector.extract_strided_slice %9 {offsets = [0, 32], sizes = [8, 32], strides = [1, 1]} : vector<8x64xf32> to vector<8x32xf32>
    %13 = arith.truncf %12 : vector<8x32xf32> to vector<8x32xbf16>
    %c0_7 = arith.constant 0 : index
    %c0_8 = arith.constant 0 : index
    %14 = vector.load %arg10[%c0_7, %c0_8] : memref<8x32xbf16, #tpu.memory_space<vmem>>, vector<8x32xbf16>
    %cst_9 = arith.constant dense<0.000000e+00> : vector<8x8xf32>
    %15 = tpu.matmul %14, %11, %cst_9 {dimension_numbers = #tpu.dot_dimension_numbers<[1], [1], [0], [0], [0, 0, 1, 0], [], []>} : vector<8x32xbf16>, vector<8x32xbf16>, vector<8x8xf32> -> vector<8x8xf32>
    %c0_10 = arith.constant 0 : index
    %c0_11 = arith.constant 0 : index
    %16 = vector.load %arg11[%c0_10, %c0_11] : memref<8x1xf32, #tpu.memory_space<vmem>>, vector<8x1xf32>
    %cst_12 = arith.constant dense<0xFF800000> : vector<8xf32>
    %17 = vector.multi_reduction <maximumf>, %15, %cst_12 [1] : vector<8x8xf32> to vector<8xf32>
    %18 = vector.shape_cast %17 : vector<8xf32> to vector<8x1xf32>
    %19 = arith.maximumf %16, %18 : vector<8x1xf32>
    %20 = arith.subf %16, %19 : vector<8x1xf32>
    %21 = math.exp %20 : vector<8x1xf32>
    %22 = vector.broadcast %19 : vector<8x1xf32> to vector<8x8xf32>
    %23 = arith.subf %15, %22 : vector<8x8xf32>
    %24 = math.exp %23 : vector<8x8xf32>
    %c0_13 = arith.constant 0 : index
    %c0_14 = arith.constant 0 : index
    %25 = vector.load %arg12[%c0_13, %c0_14] : memref<8x1xf32, #tpu.memory_space<vmem>>, vector<8x1xf32>
    %26 = arith.mulf %21, %25 : vector<8x1xf32>
    %cst_15 = arith.constant dense<0.000000e+00> : vector<8xf32>
    %27 = vector.multi_reduction <add>, %24, %cst_15 [1] : vector<8x8xf32> to vector<8xf32>
    %28 = vector.shape_cast %27 : vector<8xf32> to vector<8x1xf32>
    %29 = arith.addf %26, %28 : vector<8x1xf32>
    %c0_16 = arith.constant 0 : index
    %c0_17 = arith.constant 0 : index
    %30 = vector.load %arg12[%c0_16, %c0_17] : memref<8x1xf32, #tpu.memory_space<vmem>>, vector<8x1xf32>
    tpu.vector_store %arg12[%c0_16, %c0_17], %29 {strides = array<i32>} : memref<8x1xf32, #tpu.memory_space<vmem>>, vector<8x1xf32>,
    %c0_18 = arith.constant 0 : index
    %c0_19 = arith.constant 0 : index
    %31 = vector.load %arg13[%c0_18, %c0_19] : memref<8x32xf32, #tpu.memory_space<vmem>>, vector<8x32xf32>
    %32 = vector.broadcast %21 : vector<8x1xf32> to vector<8x32xf32>
    %33 = arith.mulf %32, %31 : vector<8x32xf32>
    %34 = arith.truncf %24 : vector<8x8xf32> to vector<8x8xbf16>
    %cst_20 = arith.constant dense<0.000000e+00> : vector<8x32xf32>
    %35 = tpu.matmul %34, %13, %cst_20 {dimension_numbers = #tpu.dot_dimension_numbers<[1], [0], [0], [1], [0, 0, 1, 1], [], []>} : vector<8x8xbf16>, vector<8x32xbf16>, vector<8x32xf32> -> vector<8x32xf32>
    %36 = arith.addf %33, %35 : vector<8x32xf32>
    %c0_21 = arith.constant 0 : index
    %c0_22 = arith.constant 0 : index
    %37 = vector.load %arg13[%c0_21, %c0_22] : memref<8x32xf32, #tpu.memory_space<vmem>>, vector<8x32xf32>
    tpu.vector_store %arg13[%c0_21, %c0_22], %36 {strides = array<i32>} : memref<8x32xf32, #tpu.memory_space<vmem>>, vector<8x32xf32>,
    %c0_23 = arith.constant 0 : index
    %c0_24 = arith.constant 0 : index
    %38 = vector.load %arg11[%c0_23, %c0_24] : memref<8x1xf32, #tpu.memory_space<vmem>>, vector<8x1xf32>
    tpu.vector_store %arg11[%c0_23, %c0_24], %19 {strides = array<i32>} : memref<8x1xf32, #tpu.memory_space<vmem>>, vector<8x1xf32>,
    %c0_i32_25 = arith.constant 0 : i32
    %39 = arith.cmpi eq, %arg2, %c0_i32_25 : i32
    %40 = arith.extui %39 : i1 to i32
    %c0_i32_26 = arith.constant 0 : i32
    %41 = arith.cmpi ne, %40, %c0_i32_26 : i32
    scf.if %41 {
      %c0_27 = arith.constant 0 : index
      %c0_28 = arith.constant 0 : index
      %42 = vector.load %arg13[%c0_27, %c0_28] : memref<8x32xf32, #tpu.memory_space<vmem>>, vector<8x32xf32>
      %c0_29 = arith.constant 0 : index
      %c0_30 = arith.constant 0 : index
      %43 = vector.load %arg12[%c0_29, %c0_30] : memref<8x1xf32, #tpu.memory_space<vmem>>, vector<8x1xf32>
      %44 = vector.broadcast %43 : vector<8x1xf32> to vector<8x32xf32>
      %45 = arith.divf %42, %44 : vector<8x32xf32>
      %c0_31 = arith.constant 0 : index
      %c0_32 = arith.constant 0 : index
      %c0_33 = arith.constant 0 : index
      %46 = vector.load %arg9[%c0_31, %c0_32, %c0_33] : memref<1x8x32xf32, #tpu.memory_space<vmem>>, vector<1x8x32xf32>
      %47 = vector.shape_cast %46 : vector<1x8x32xf32> to vector<8x32xf32>
      %48 = vector.shape_cast %45 : vector<8x32xf32> to vector<1x8x32xf32>
      tpu.vector_store %arg9[%c0_31, %c0_32, %c0_33], %48 {strides = array<i32>} : memref<1x8x32xf32, #tpu.memory_space<vmem>>, vector<1x8x32xf32>,
    } else {
    }
    return
  }
  func.func @transform_0(%arg0: i32, %arg1: i32, %arg2: i32) -> (i32, i32, i32) {
    %c0_i32 = arith.constant 0 : i32
    %c0_i32_0 = arith.constant 0 : i32
    return %arg0, %arg1, %c0_i32 : i32, i32, i32
  }
  func.func @transform_1(%arg0: i32, %arg1: i32, %arg2: i32) -> (i32, i32, i32) {
    %c0_i32 = arith.constant 0 : i32
    %c0_i32_0 = arith.constant 0 : i32
    return %arg0, %arg2, %c0_i32 : i32, i32, i32
  }
  func.func @transform_2(%arg0: i32, %arg1: i32, %arg2: i32) -> (i32, i32) {
    %c0_i32 = arith.constant 0 : i32
    %c0_i32_0 = arith.constant 0 : i32
    %c0_i32_1 = arith.constant 0 : i32
    return %c0_i32, %c0_i32_0 : i32, i32
  }
  func.func @transform_3(%arg0: i32, %arg1: i32, %arg2: i32) -> (i32, i32) {
    %c0_i32 = arith.constant 0 : i32
    %c0_i32_0 = arith.constant 0 : i32
    %c0_i32_1 = arith.constant 0 : i32
    return %c0_i32, %c0_i32_0 : i32, i32
  }
  func.func @transform_4(%arg0: i32, %arg1: i32, %arg2: i32) -> (i32, i32) {
    %c0_i32 = arith.constant 0 : i32
    %c0_i32_0 = arith.constant 0 : i32
    %c0_i32_1 = arith.constant 0 : i32
    return %c0_i32, %c0_i32_0 : i32, i32
  }
  func.func @transform_5(%arg0: i32, %arg1: i32, %arg2: i32) -> (i32, i32) {
    %c0_i32 = arith.constant 0 : i32
    %c0_i32_0 = arith.constant 0 : i32
    %c0_i32_1 = arith.constant 0 : i32
    return %c0_i32, %c0_i32_0 : i32, i32
  }
  func.func @transform_6(%arg0: i32, %arg1: i32, %arg2: i32) -> (i32, i32, i32) {
    %c0_i32 = arith.constant 0 : i32
    %c0_i32_0 = arith.constant 0 : i32
    return %arg0, %arg1, %c0_i32 : i32, i32, i32
  }
}

</mosaic_0001>

<bundles_post_ra>
// kernel: tpu_custom_call.1
= control target key start
LH: loop header
LB: loop body
LE: loop exit
PB: predicated region body
PF: predicated region fallthrough
CT: control target
= control target key end

     0   :  { %s1539_s0 = inlined_call_operand.hbm [shape: bf16[2,8,32], index: 0, kind: input, shape index: {}]   ;;  %s1540_s1 = inlined_call_operand.hbm [shape: bf16[2,8,32], index: 1, kind: input, shape index: {}]   ;;  %s1541_s2 = inlined_call_operand.hbm [shape: bf16[32,32], index: 2, kind: input, shape index: {}]   ;;  %s1542_s3 = inlined_call_operand.hbm [shape: bf16[32,64], index: 3, kind: input, shape index: {}]   ;;  %s1543_s4 = inlined_call_operand.vmem [shape: f32[1,32], index: 4, kind: input, shape index: {}]   ;;  %s1544_s5 = inlined_call_operand.vmem [shape: f32[1,64], index: 5, kind: input, shape index: {}]   ;;  %s1545_s6 = inlined_call_operand.hbm [shape: f32[2,8,32], index: 6, kind: output, shape index: {}]  }
   0x1   :  { %1552 = sst [smem:[#allocation23_spill]] %s1541_s2 }
   0x2   :  { %1553 = sst [smem:[#allocation24_spill]] %s1542_s3 }
   0x3   :  { %11 = vsyncpa [#allocation7], 0 }
   0x4   :  { %13 = vsyncpa [#allocation7 + $0x1], 0 }
   0x5   :  { %14 = vsyncpa [#allocation10], 0 }
   0x6   :  { %16 = vsyncpa [#allocation10 + $0x1], 0 }
   0x7   :  { %17 = vsyncpa [#allocation13], 0 }
   0x8   :  { %18 = vsyncpa [#allocation8], 0 }
   0x9   :  { %20 = vsyncpa [#allocation8 + $0x1], 0  ;;  %s1230_s21 = smov 0   ;;  %s1232_s22 = smov 0  }
   0xa   :  { %s1234_s23 = smov 0   ;;  %s1236_s24 = smov 0  }
   0xb   :  { %s1238_s25 = smov 0   ;;  %s1240_s26 = smov 0  }
   0xc LB: > { %1554 = sst [smem:[#allocation20_spill]] %s1177_s25  ;;  %s1261_s27 = sadd.s32 4294967295, %s1181_s26   ;;  %s1181_s26 = sphi %s1240_s26, %s26_s26   ;;  %s1177_s25 = sphi %s1238_s25, %s1577_s25   ;;  %s1173_s24 = sphi %s1236_s24, %s1576_s24   ;;  %s1169_s23 = sphi %s1234_s23, %s1580_s23   ;;  %s1165_s22 = sphi %s1232_s22, %s1579_s22   ;;  %s1161_s21 = sphi %s1230_s21, %s1578_s21  }
   0xd   : > { %s797_s28 = sadd.s32 4294967294, %s1181_s26   ;;  %p67_p0 = scmp.ne.s32.totalorder %s1165_s22, %s1161_s21 }
   0xe   : > { %p1546_p1 = scmp.eq.s32.totalorder %s1261_s27, 0  ;;  %p211_p3 = scmp.eq.s32.totalorder %s797_s28, 1 }
   0xf   : > { %p798_p5 = scmp.ge.s32.totalorder %s1181_s26, 1  ;;  %p218_p7 = scmp.lt.s32.totalorder %s1181_s26, 3 }
  0x10   : > { %p1270_p4 = por %p1546_p1, %p67_p0  ;;  %p1275_p6 = por %p211_p3, %p67_p0 }
  0x11   : > { %p1280_p8 = pnand %p798_p5, %p218_p7  ;;  %s1183_s8 = smov [#allocation11]  }
  0x12   : > { %s1555_s29 = scalar_select %p1270_p4, 1, 0 }
  0x13   : > { %s1556_s30 = scalar_select %p1275_p6, 1, 0 }
  0x14   : > { %s1557_s7 = scalar_select %p1280_p8, 1, 0 }
  0x15   : > { %s230_s9 = sshll.u32 %s1183_s8, 4  ;;  %p878_p9 = pneg %p1280_p8  ;;  %s1284_s9 = int_to_ptr.vmem [resolvable:$true] %s230_s9 }
  0x16   : > { %s1184_s11 = smov [#allocation12]   ;;  %s1559_s2 = sld [smem:[#allocation23_spill]] }
  0x17   : > { %p1291_p11 = pnand %p878_p9, %p1546_p1  ;;  %s243_s12 = sshll.u32 %s1184_s11, 4  ;;  %s1295_s12 = int_to_ptr.vmem [resolvable:$true] %s243_s12 }
  0x19   : > { %p973_p13 = pneg %p1291_p11 }
  0x1c   : > { %s971_s15 = scalar_lea.hbm %s1559_s2, 256 }
  0x1d   : > { %p972_p12 = scmp.ne.s32.totalorder %s1559_s2, %s971_s15  ;;  %p978_p5 = scmp.lt.u32.totalorder %s971_s15, %s1559_s2 }
  0x1f   : > { %p974_p0 = pnand %p973_p13, %p972_p12 }
  0x21   : > { %p975_p3 = pneg %p974_p0 }
  0x23   : > { %p980_p7 = pnand %p978_p5, %p975_p3 }
  0x25   : > { %983 = shalt.err (!%p980_p7)
}
  0x26   : > { %s984_s20 = scalar_lea.vmem %s1284_s9, 256  ;;  %p992_p2 = scmp.lt.s32.totalorder %s1284_s9, %s1284_s9 }
  0x27   : > { %p985_p9 = scmp.ne.s32.totalorder %s1284_s9, %s984_s20  ;;  %p993_p12 = scmp.lt.s32.totalorder %s984_s20, %s984_s20 }
  0x29   : > { %p987_p10 = pnand %p985_p9, %p973_p13  ;;  %p994_p0 = por %p993_p12, %p992_p2 }
  0x2b   : > { %p988_p1 = pneg %p987_p10 }
  0x2d   : > { %p995_p6 = pnand %p994_p0, %p988_p1 }
  0x2f   : > { %998 = shalt.err (!%p995_p6)
}
  0x30   : > { %s1185_s28 = smov 64   ;;  %s1186_s8 = smov 4  }
  0x31   : > { %881 = dma.hbm_to_vmem [thread:$0]  (!%p1291_p11), %s1559_s2, 256, %s1284_s9, [#allocation10], %s1185_s28, %s1185_s28, %s1186_s8  }
  0x32   : > { %s1560_s3 = sld [smem:[#allocation24_spill]] }
  0x38   : > { %s999_s16 = scalar_lea.hbm %s1560_s3, 256 }
  0x39   : > { %p1000_p2 = scmp.ne.s32.totalorder %s1560_s3, %s999_s16  ;;  %p1006_p10 = scmp.lt.u32.totalorder %s999_s16, %s1560_s3 }
  0x3b   : > { %p1002_p1 = pnand %p1000_p2, %p973_p13 }
  0x3d   : > { %p1003_p6 = pneg %p1002_p1 }
  0x3f   : > { %p1008_p3 = pnand %p1006_p10, %p1003_p6 }
  0x41   : > { %1011 = shalt.err (!%p1008_p3)
}
  0x42   : > { %s1012_s9 = scalar_lea.vmem %s1295_s12, 256  ;;  %p1020_p12 = scmp.lt.s32.totalorder %s1295_s12, %s1295_s12 }
  0x43   : > { %p1013_p5 = scmp.ne.s32.totalorder %s1295_s12, %s1012_s9  ;;  %p1021_p0 = scmp.lt.s32.totalorder %s1012_s9, %s1012_s9 }
  0x45   : > { %p1015_p7 = pnand %p1013_p5, %p973_p13  ;;  %p1022_p2 = por %p1021_p0, %p1020_p12 }
  0x47   : > { %p1016_p9 = pneg %p1015_p7 }
  0x49   : > { %p1023_p1 = pnand %p1022_p2, %p1016_p9 }
  0x4b   : > { %1026 = shalt.err (!%p1023_p1)
}
  0x4c   : > { %884 = dma.hbm_to_vmem [thread:$0]  (!%p1291_p11), %s1560_s3, 256, %s1295_s12, [#allocation13], %s1185_s28, %s1185_s28, %s1186_s8  }
  0x4d   : > { %s45_s14 = sadd.s32 1, %s1177_s25  ;;  %s54_s15 = sadd.s32 1, %s1169_s23 }
  0x4e   : > { %p47_p13 = scmp.ge.s32.totalorder %s45_s14, 2  ;;  %p61_p6 = scmp.ne.s32.totalorder %s1169_s23, %s1165_s22 }
  0x4f   : > { %p62_p10 = scmp.eq.s32.totalorder %s1181_s26, 0  ;;  %p898_p3 = scmp.lt.s32.totalorder %s1181_s26, 2 }
  0x50   : > { %s1582_s14 = smov (%p47_p13, %s45_s14), 0  ;;  %p1562_p7 = scmp.eq.s32.totalorder %s1261_s27, 1 }
  0x51   : > { %1561 = sst [smem:[#allocation21_spill]] %s1582_s14  ;;  %p63_p5 = por %p62_p10, %p61_p6 }
  0x52   : > { %p1359_p9 = por %p1562_p7, %p61_p6  ;;  %s49_s16 = ssub.s32 %s1177_s25, %s1582_s14 }
  0x53   : > { %s263_s17 = sand.u32 1, %s1169_s23   ;;  %p52_p12 = scmp.eq.s32.totalorder %s49_s16, 0 }
  0x54   : > { %s1563_s10 = scalar_select %p1359_p9, 1, 0 }
  0x55   : > { %s1366_s12 = sshll.u32 %s263_s17, 2  ;;  %s803_s28 = sshll.u32 %s1177_s25, 6 }
  0x56   : > { %s1370_s8 = scalar_select %p52_p12, %s1169_s23, %s54_s15  }
  0x57   : > { %s1375_s20 = scalar_lea.hbm %s1539_s0, %s803_s28  ;;  %s267_s9 = scalar_lea.vmem [#allocation6], %s1366_s12 }
  0x58   : > { %1564 = sst [smem:[#allocation22_spill]] %s1370_s8  ;;  %s275_s11 = sshll.u32 %s267_s9, 4  ;;  %s1384_s11 = int_to_ptr.vmem [resolvable:$true] %s275_s11 }
  0x59   : > { %p1380_p11 = pnand %p898_p3, %p63_p5  ;;  %s1389_s18 = scalar_lea.hbm %s1540_s1, %s803_s28 }
  0x5a   : > { %s264_s19 = scalar_lea.sflag [#allocation7], %s263_s17  ;;  %s1027_s2 = scalar_lea.hbm %s1375_s20, 64 }
  0x5b   : > { %p1028_p0 = scmp.ne.s32.totalorder %s1375_s20, %s1027_s2  ;;  %p1029_p2 = pneg %p1380_p11 }
  0x5c   : > { %s1032_s14 = scalar_lea.hbm %s1539_s0, 128  ;;  %p1033_p6 = scmp.lt.u32.totalorder %s1375_s20, %s1539_s0 }
  0x5d   : > { %p1030_p1 = pnand %p1029_p2, %p1028_p0  ;;  %p1034_p10 = scmp.lt.u32.totalorder %s1032_s14, %s1027_s2 }
  0x5e   : > { %p1036_p5 = scmp.lt.u32.totalorder %s1027_s2, %s1375_s20 }
  0x5f   : > { %p1031_p13 = pneg %p1030_p1  ;;  %p1035_p3 = por %p1034_p10, %p1033_p6 }
  0x61   : > { %p1037_p7 = por %p1036_p5, %p1035_p3 }
  0x63   : > { %p1038_p12 = pnand %p1037_p7, %p1031_p13 }
  0x65   : > { %1041 = shalt.err (!%p1038_p12)
}
  0x66   : > { %s1042_s17 = scalar_lea.vmem %s1384_s11, 64  ;;  %s1187_s3 = smov [#allocation6]  }
  0x67   : > { %p1043_p0 = scmp.ne.s32.totalorder %s1384_s11, %s1042_s17  ;;  %s1047_s28 = sshll.u32 %s1187_s3, 4  ;;  %s1048_s28 = int_to_ptr.vmem [resolvable:$false] %s1047_s28 }
  0x68   : > { %s1049_s25 = scalar_lea.vmem %s1048_s28, 128  ;;  %p1050_p4 = scmp.lt.s32.totalorder %s1384_s11, %s1048_s28 }
  0x69   : > { %p1045_p1 = pnand %p1043_p0, %p1029_p2  ;;  %p1051_p6 = scmp.lt.s32.totalorder %s1049_s25, %s1042_s17 }
  0x6b   : > { %p1046_p9 = pneg %p1045_p1  ;;  %p1052_p10 = por %p1051_p6, %p1050_p4 }
  0x6d   : > { %p1053_p3 = pnand %p1052_p10, %p1046_p9 }
  0x6f   : > { %1056 = shalt.err (!%p1053_p3)
}
  0x70   : > { %888 = dma.hbm_to_vmem [thread:$0]  (!%p1380_p11), %s1375_s20, 64, %s1384_s11, %s264_s19  }
  0x71   : > { %s282_s2 = sand.u32 1, %s1181_s26   ;;  %s286_s14 = scalar_lea.vmem [#allocation9], %s1366_s12 }
  0x72   : > { %s294_s8 = sshll.u32 %s286_s14, 4  ;;  %s283_s15 = scalar_lea.sflag [#allocation10], %s282_s2  ;;  %s295_s8 = int_to_ptr.vmem [resolvable:$true] %s294_s8 }
  0x73   : > { %s1057_s16 = scalar_lea.hbm %s1389_s18, 64  ;;  %s1062_s3 = scalar_lea.hbm %s1540_s1, 128 }
  0x74   : > { %p1058_p4 = scmp.ne.s32.totalorder %s1389_s18, %s1057_s16  ;;  %p1063_p5 = scmp.lt.u32.totalorder %s1389_s18, %s1540_s1 }
  0x75   : > { %p1064_p7 = scmp.lt.u32.totalorder %s1062_s3, %s1057_s16  ;;  %p1066_p0 = scmp.lt.u32.totalorder %s1057_s16, %s1389_s18 }
  0x76   : > { %p1060_p9 = pnand %p1058_p4, %p1029_p2 }
  0x77   : > { %p1065_p12 = por %p1064_p7, %p1063_p5 }
  0x78   : > { %p1061_p13 = pneg %p1060_p9 }
  0x79   : > { %p1067_p1 = por %p1066_p0, %p1065_p12 }
  0x7b   : > { %p1068_p6 = pnand %p1067_p1, %p1061_p13 }
  0x7d   : > { %1071 = shalt.err (!%p1068_p6)
}
  0x7e   : > { %s1072_s12 = scalar_lea.vmem %s295_s8, 64  ;;  %s1188_s20 = smov [#allocation9]  }
  0x7f   : > { %p1073_p10 = scmp.ne.s32.totalorder %s295_s8, %s1072_s12  ;;  %s1077_s11 = sshll.u32 %s1188_s20, 4  ;;  %s1078_s11 = int_to_ptr.vmem [resolvable:$false] %s1077_s11 }
  0x80   : > { %s1079_s19 = scalar_lea.vmem %s1078_s11, 128  ;;  %p1080_p9 = scmp.lt.s32.totalorder %s295_s8, %s1078_s11 }
  0x81   : > { %p1075_p3 = pnand %p1073_p10, %p1029_p2  ;;  %p1081_p8 = scmp.lt.s32.totalorder %s1079_s19, %s1072_s12 }
  0x83   : > { %p1076_p4 = pneg %p1075_p3  ;;  %p1082_p5 = por %p1081_p8, %p1080_p9 }
  0x85   : > { %p1083_p7 = pnand %p1082_p5, %p1076_p4 }
  0x87   : > { %1086 = shalt.err (!%p1083_p7)
}
  0x88   : > { %891 = dma.hbm_to_vmem [thread:$0]  (!%p1380_p11), %s1389_s18, 64, %s295_s8, %s283_s15  }
  0x89   : > { %p1566_p13 = scmp.ne.s32.totalorder %s1557_s7, 0 }
  0x8a   : > { %s1440_s2 = sand.u32 (!%p1566_p13), 1, %s1165_s22   ;;  %p1567_p2 = scmp.ne.s32.totalorder (!%p1566_p13), %s1555_s29, 0 }
  0x8b   : > { %303 = sbr.rel (%p1566_p13) target bundleno = 1198 (0x4ae), region = 44  ;;  %s807_s14 = sshll.u32 (!%p1566_p13), %s1440_s2, 2 }
  0x8c   : > { %s306_s16 = scalar_lea.sflag (!%p1566_p13), [#allocation7], %s1440_s2  ;;  %s309_s9 = scalar_lea.vmem (!%p1566_p13), [#allocation6], %s807_s14 }
  0x92   : > { %1140 = dma.done.wait (%p1567_p2), %s306_s16, 64  }
  0x93   : > { %1142 = vsyncadd (%p1567_p2), %s306_s16, 4294967232  ;;  %s314_s13 = sand.u32 1, %s1261_s27   ;;  %s318_s7 = scalar_lea.vmem [#allocation9], %s807_s14 }
  0x94   : > { %s315_s18 = scalar_lea.sflag [#allocation10], %s314_s13 }
  0x95   : > { %1144 = dma.done.wait (%p1567_p2), %s315_s18, 64  }
  0x96   : > { %1146 = vsyncadd (%p1567_p2), %s315_s18, 4294967232  ;;  %p1568_p8 = scmp.eq.s32.totalorder %s1261_s27, 0 }
  0x98   : > { %1148 = dma.done.wait (%p1568_p8), [#allocation10], 256   ;;  %p1569_p11 = pmov %p1568_p8 }
  0x99   : > { %p1570_p12 = pmov %p1568_p8 }
  0x9a   : > { %1150 = vsyncadd (%p1569_p11), [#allocation10], 4294967040 }
  0x9b   : > { %1152 = dma.done.wait (%p1570_p12), [#allocation13], 256   ;;  %p1571_p0 = pmov %p1568_p8 }
  0x9c   : > { %vm389_vm0 = vcmask 261120   ;;  %v1189_v0 = vmov 0.0   ;;  %vm1190_vm1 = vmmov 0   ;;  %v961_v1 = vld [vmem:[#allocation11] sm:$0xff]   ;;  %v962_v2 = vld [vmem:[#allocation12] sm:$0xff]   ;;  %v963_v3 = vld [vmem:[#allocation11 + $0x8] sm:$0xff]  }
  0x9d   : > { %1154 = vsyncadd (%p1571_p0), [#allocation13], 4294967040  ;;  %836 = vmatprep.subr.bf16.mxu0 %v1189_v0  ;;  %844 = vmatprep.subr.bf16.mxu1 %v1189_v0  ;;  %439 = vst.msk [vmem:[#allocation5] sm:$0xff] %vm389_vm0, %v1189_v0  ;;  %v964_v4 = vld [vmem:[#allocation12 + $0x8] sm:$0xff]   ;;  %v365_v5 = vld [vmem:[%s309_s9] sm:$0xf] }
  0x9e   : > { %840 = vmatprep.mubr.msk.bf16.mxu0 %vm1190_vm1, %v1189_v0  ;;  %848 = vmatprep.mubr.msk.bf16.mxu1 %vm1190_vm1, %v1189_v0  ;;  %v440_v6 = vld [vmem:[%s318_s7] sm:$0xf]  ;;  %v812_v7 = vld [vmem:[%s1543_s4] ss:$0 sm:$0xff]  ;;  %vm434_vm2 = vcmask 257024   ;;  %s1191_s17 = smov 96  }
  0x9f   : > { %837 = vmatpush3.bf16.msra.mxu0 %v961_v1  ;;  %845 = vmatpush3.bf16.msra.mxu1 %v962_v2  ;;  %v816_v8 = vld [vmem:[%s1544_s5] ss:$0 sm:$0xff]  ;;  %vm436_vm3 = vcmask 7168   ;;  %v1192_v23 = vmov -inf   ;;  %vm595_vm4 = vcmask 1043456   ;;  %vm557_vm5 = vcmask 64512  }
  0xa0   : > { %838 = vmatprep.subr.bf16.mxu0 %v1189_v0  ;;  %846 = vmatprep.subr.bf16.mxu1 %v1189_v0  ;;  %437 = vst.msk [vmem:[#allocation3] sm:$0xff] %vm436_vm3, %v1192_v23  ;;  %438 = vst.msk [vmem:[#allocation4] sm:$0xff] %vm436_vm3, %v1189_v0  ;;  %v1193_v31 = vmov 0   ;;  %s811_s3 = sshll.u32 %s1440_s2, 3  ;;  %s823_s28 = sshll.u32 %s1173_s24, 7 }
  0xa1   : > { %959 = vset.pattern.permute.xlu0 %v1193_v31  ;;  %960 = vset.pattern.permute.xlu1 %v1193_v31  ;;  %s359_s25 = scalar_lea.vmem [#allocation14], %s811_s3  ;;  %s1489_s19 = scalar_lea.hbm %s1545_s6, %s823_s28 }
  0xa2   : > { %s670_s12 = sshll.u32 %s359_s25, 4  ;;  %s656_s14 = scalar_lea.sflag [#allocation8], %s1440_s2  ;;  %s1491_s12 = int_to_ptr.vmem [resolvable:$true] %s670_s12 }
  0xa3   : > { %839 = vmatpush3.bf16.msra.mxu0 %v963_v3  ;;  %847 = vmatpush3.bf16.msra.mxu1 %v964_v4  ;;  %s1087_s16 = scalar_lea.vmem %s1491_s12, 128  ;;  %p1572_p6 = scmp.ne.s32.totalorder %s1563_s10, 0 }
  0xa4   : > { %852 = vmatprep.subr.bf16.mxu0 %v1189_v0  ;;  %858 = vmatprep.subr.bf16.mxu1 %v1189_v0  ;;  %v581_v49 = vld [vmem:[#allocation5] sm:$0xff]  ;;  %p1088_p1 = scmp.ne.s32.totalorder %s1491_s12, %s1087_s16  ;;  %s1194_s24 = smov [#allocation14]  }
  0xa5   : > { %s1091_s9 = sshll.u32 %s1194_s24, 4  ;;  %s1092_s9 = int_to_ptr.vmem [resolvable:$false] %s1091_s9 }
  0xa6   : > { %841 = vmatmul.mubr.msk.bf16.vlgmr.msra.gmra.mrb[0].mxu0 %vm389_vm0, %v365_v5  ;;  %849 = vmatmul.mubr.msk.bf16.vlgmr.msra.gmra.mrb[0].mxu1 %vm389_vm0, %v440_v6  ;;  %p1089_p10 = pnand %p1088_p1, %p1572_p6  ;;  %s1093_s13 = scalar_lea.vmem %s1092_s9, 256 }
  0xa7   : > { %854 = vmatprep.mubr.msk.bf16.mxu0 %vm1190_vm1, %v1189_v0  ;;  %860 = vmatprep.mubr.msk.bf16.mxu1 %vm1190_vm1, %v1189_v0  ;;  %v556_v32 = vld [vmem:[#allocation3] sm:$0xff]  ;;  %v573_v44 = vld [vmem:[#allocation4] sm:$0xff]  ;;  %p1094_p4 = scmp.lt.s32.totalorder %s1491_s12, %s1092_s9  ;;  %p1095_p9 = scmp.lt.s32.totalorder %s1093_s13, %s1087_s16 }
  0xa8   : > { %p1090_p3 = pneg %p1089_p10 }
  0xa9   : > { %p1096_p5 = por %p1095_p9, %p1094_p4 }
  0xab   : > { %p1097_p7 = pnand %p1096_p5, %p1090_p3 }
 0x179   : > { %v427_v9 = vpop.f32.mrb[0].mxu0  ;;  %v502_v11 = vpop.f32.mrb[0].mxu1 }
 0x17a   : > { %v428_v10 = vadd.f32 %v812_v7, %v427_v9  ;;  %v842_v12 = vpop.f32.mrb[1].mxu0  ;;  %v503_v13 = vadd.f32 %v816_v8, %v502_v11  ;;  %v850_v14 = vpop.f32.mrb[1].mxu1 }
 0x17b   : > { %v430_v15 = vpop.f32.mrb[2].mxu0  ;;  %v505_v17 = vpop.f32.mrb[2].mxu1 }
 0x17c   : > { %v433_v16 = vpack.c.bf16 %v428_v10, %v428_v10  ;;  %v843_v18 = vpop.f32.mrb[3].mxu0  ;;  %v508_v19 = vpack.c.bf16 %v503_v13, %v503_v13  ;;  %v851_v20 = vpop.f32.mrb[3].mxu1 }
 0x17e   : > { %435 = vst.msk [vmem:[#allocation2] sm:$0xf] %vm434_vm2, %v433_v16  ;;  %v514_v21 = vsel %vm389_vm0, %v508_v19, 0  ;;  %590 = vrot.lane.b32.xlu1 %v508_v19, %s1191_s17 }
 0x17f   : > { %853 = vmatpush3.bf16.xpose.msra.mxu0 %v514_v21 }
 0x185   : > { %v509_v22 = vld [vmem:[#allocation2] sm:$0xf] }
 0x186   : > { %855 = vmatmul.mubr.msk.bf16.vlgmr.msra.gmra.mrb[4].mxu0 %vm389_vm0, %v509_v22 }
 0x1f0   : > { %v591_v24 = vpop.permute.xlu1 %590 }
 0x1f1   : > { %v597_v25 = vsel %vm595_vm4, %v591_v24, 0 }
 0x1f2   : > { %859 = vmatpush3.bf16.msra.mxu1 %v597_v25 }
 0x259   : > { %v550_v26 = vpop.f32.mrb[4].mxu0 }
 0x25a   : > { %v856_v27 = vpop.f32.mrb[5].mxu0  ;;  %v558_v28 = vsel %vm557_vm5, %v550_v26, -inf }
 0x25b   : > { %559 = vmax.xlane.f32.xlu0 %v558_v28  ;;  %v553_v29 = vpop.f32.mrb[6].mxu0 }
 0x25c   : > { %v857_v30 = vpop.f32.mrb[7].mxu0 }
 0x2e8   : > { %v560_v33 = vpop.xlane.xlu0 %559 }
 0x2e9   : > { %v561_v34 = vmax.f32 %v556_v32, %v560_v33 }
 0x2eb   : > { %v562_v35 = vsub.f32 %v556_v32, %v561_v34  ;;  %641 = vst.msk [vmem:[#allocation3] sm:$0xff] %vm436_vm3, %v561_v34  ;;  %567 = vperm.xlu0 %959, %v561_v34  }
 0x2ed   : > { %v563_v42 = vmul.f32 1.442695, %v562_v35 }
 0x36a   : > { %v568_v36 = vpop.permute.xlu0 %567 }
 0x36b   : > { %v570_v37 = vsub.f32 %v550_v26, %v568_v36 }
 0x36d   : > { %v571_v38 = vmul.f32 1.442695, %v570_v37 }
 0x36f   : > { %965 = vpow2.f32 %v571_v38 }
 0x370   : > { %967 = vpow2.f32 %v563_v42 }
 0x379   : > { %v966_v39 = vpop.eup %965 }
 0x37a   : > { %v575_v40 = vsel %vm557_vm5, %v966_v39, 0.0  ;;  %v588_v41 = vpack.c.bf16 %v966_v39, %v966_v39  ;;  %v968_v43 = vpop.eup %967 }
 0x37b   : > { %576 = vadd.xlane.f32.xlu1 %v575_v40  ;;  %v574_v45 = vmul.f32 %v968_v43, %v573_v44 }
 0x37c   : > { %861 = vmatmul.mubr.msk.bf16.vlgmr.msra.gmra.mrb[4].mxu1 %vm557_vm5, %v588_v41 }
 0x38c   : > { %584 = vperm.xlu1 %960, %v968_v43  }
 0x408   : > { %v577_v46 = vpop.xlane.xlu1 %576 }
 0x409   : > { %v578_v47 = vadd.f32 %v577_v46, %v574_v45 }
 0x40b   : > { %580 = vst.msk [vmem:[#allocation4] sm:$0xff] %vm436_vm3, %v578_v47 }
 0x40c   : > { %v585_v50 = vpop.permute.xlu1 %584 }
 0x40d   : > { %v587_v51 = vmul.f32 %v585_v50, %v581_v49 }
 0x412   : > { %v646_v48 = vld [vmem:[#allocation4] sm:$0xff] }
 0x413   : > { %649 = vperm.xlu0 %959, %v646_v48  }
 0x44f   : > { %v633_v52 = vpop.f32.mrb[4].mxu1 }
 0x450   : > { %v639_v53 = vadd.f32 %v633_v52, %v587_v51  ;;  %v862_v54 = vpop.f32.mrb[5].mxu1 }
 0x451   : > { %v636_v55 = vpop.f32.mrb[6].mxu1 }
 0x452   : > { %640 = vst.msk [vmem:[#allocation5] sm:$0xff] %vm389_vm0, %v639_v53  ;;  %v863_v56 = vpop.f32.mrb[7].mxu1 }
 0x459   : > { %v645_v59 = vld [vmem:[#allocation5] sm:$0xff] }
 0x492   : > { %v650_v57 = vpop.permute.xlu0 %649 }
 0x493   : > { %969 = vrcp.f32 %v650_v57 }
 0x49d   : > { %v970_v58 = vpop.eup %969 }
 0x49e   : > { %v653_v60 = vmul.f32 %v970_v58, %v645_v59 }
 0x4a0   : > { %654 = vst.msk [vmem:[%s359_s25] sm:$0xff] %vm389_vm0, %v653_v60 }
 0x4a1   : > { %1100 = shalt.err (!%p1097_p7)
}
 0x4a2   : > { %s1101_s2 = scalar_lea.hbm %s1489_s19, 128  ;;  %s1105_s27 = scalar_lea.hbm %s1545_s6, 256 }
 0x4a3   : > { %p1102_p13 = scmp.ne.s32.totalorder %s1489_s19, %s1101_s2  ;;  %p1106_p11 = scmp.lt.u32.totalorder %s1489_s19, %s1545_s6 }
 0x4a4   : > { %p1107_p12 = scmp.lt.u32.totalorder %s1105_s27, %s1101_s2  ;;  %p1109_p1 = scmp.lt.u32.totalorder %s1101_s2, %s1489_s19 }
 0x4a5   : > { %p1103_p2 = pnand %p1102_p13, %p1572_p6 }
 0x4a6   : > { %p1108_p0 = por %p1107_p12, %p1106_p11 }
 0x4a7   : > { %p1104_p8 = pneg %p1103_p2 }
 0x4a8   : > { %p1110_p10 = por %p1109_p1, %p1108_p0 }
 0x4aa   : > { %p1111_p3 = pnand %p1110_p10, %p1104_p8 }
 0x4ac   : > { %1114 = shalt.err (!%p1111_p3)
}
 0x4ad   : > { %876 = dma.vmem_to_hbm [thread:$0]  (%p1572_p6), %s1491_s12, 128, %s1489_s19, %s656_s14  }
 0x4ae PF: > { %s682_s15 = sand.u32 1, %s1161_s21   ;;  %p1573_p4 = scmp.ne.s32.totalorder %s1556_s30, 0 }
 0x4af   : > { %p1574_p9 = scmp.ge.s32.totalorder %s1181_s26, 2  ;;  %s683_s17 = scalar_lea.sflag [#allocation8], %s682_s15 }
 0x4b1   : > { %p893_p5 = pnand %p1574_p9, %p1573_p4 }
 0x4b3   : > { %1156 = dma.done.wait (!%p893_p5), %s683_s17, 128  }
 0x4b4   : > { %1158 = vsyncadd (!%p893_p5), %s683_s17, 4294967168  ;;  %s26_s26 = sadd.s32 1, %s1181_s26   ;;  %s1575_s10 = sld [smem:[#allocation22_spill]] }
 0x4b5   : > { %p23_p7 = scmp.ge.s32.totalorder %s26_s26, 4   ;;  %s1576_s24 = sld [smem:[#allocation20_spill]] }
 0x4b6   : > { %s1577_s25 = sld [smem:[#allocation21_spill]]  ;;  %s1578_s21 = smov %s1165_s22 }
 0x4b7   : > { %s1579_s22 = smov %s1169_s23  ;;  %25 = sbr.rel (!%p23_p7) target bundleno = 12 (0xc), region = 118 }
 0x4ba   : > { %s1580_s23 = smov %s1575_s10 }
 0x4be   :  { %688 = vsyncpa [#allocation7], 1 }
 0x4bf   :  { %690 = vsyncpa [#allocation7 + $0x1], 1 }
 0x4c0   :  { %691 = vsyncpa [#allocation10], 1 }
 0x4c1   :  { %693 = vsyncpa [#allocation10 + $0x1], 1 }
 0x4c2   :  { %694 = vsyncpa [#allocation13], 1 }
 0x4c3   :  { %695 = vsyncpa [#allocation8], 1 }
 0x4c4   :  { %697 = vsyncpa [#allocation8 + $0x1], 1 }

</bundles_post_ra>
